<compile_context>
chip_gen: v5e
topology: v5e:2x2
jax: 0.10.0
libtpu: 0.0.40
codegen_flags: <defaults>
</compile_context>

<pallas_src>
import math

import jax
import jax.numpy as jnp
from jax import lax
from jax.experimental import pallas as pl
from jax.experimental.pallas import tpu as pltpu


_CONTRACT_LAST = (((1,), (1,)), ((), ()))   # x @ W^T: contract last dim of both


def _ffn_kernel(x_ref, w1a_ref, w1g_ref, w2_ref, w3_ref, o_ref, acc_ref):
    """One (row-tile, hidden-tile) step of the fused FeedForward.

    x_ref  : (tm, D)   input rows (resident across the hidden axis)
    w1a_ref: (tn, D)   rows [0:2D) of W1      -> "a" half of h1
    w1g_ref: (tn, D)   rows [2D:4D) of W1     -> SwiGLU gates
    w2_ref : (tn, D)   rows of W2
    w3_ref : (D, tn)   contracting slice of W3
    o_ref  : (tm, D)   output rows
    acc_ref: (tm, D)   f32 accumulator over the hidden axis
    """
    j = pl.program_id(1)

    @pl.when(j == 0)
    def _():
        acc_ref[...] = jnp.zeros_like(acc_ref)

    x = x_ref[...]                      # native dtype straight into the MXU
    a = lax.dot_general(x, w1a_ref[...], _CONTRACT_LAST,
                        preferred_element_type=jnp.float32)
    g = lax.dot_general(x, w1g_ref[...], _CONTRACT_LAST,
                        preferred_element_type=jnp.float32)
    h2 = lax.dot_general(x, w2_ref[...], _CONTRACT_LAST,
                         preferred_element_type=jnp.float32)

    # SwiGLU * W2 branch, elementwise in f32 (VPU + EUP slots; hidden under MXU).
    z = a * (g * jax.nn.sigmoid(g)) * h2

    w3 = w3_ref[...]
    acc_ref[...] += lax.dot_general(z.astype(w3.dtype), w3, _CONTRACT_LAST,
                                    preferred_element_type=jnp.float32)

    # TODO(synk): training-mode dropout would go here via pltpu.prng_seed +
    # pltpu.prng_random_bits on the finalized (tm, D) tile; eval mode = identity.
    @pl.when(j == pl.num_programs(1) - 1)
    def _():
        o_ref[...] = acc_ref[...].astype(o_ref.dtype)


def _pick_tile(dim, target, granule):
    """Largest tile <= target that divides `dim` (stepping by `granule`), else dim."""
    t = min(target, dim)
    if dim % t == 0:
        return t
    t = (t // granule) * granule
    while t >= granule:
        if dim % t == 0:
            return t
        t -= granule
    return dim


def feed_forward(x, w1, w2, w3, *, tile_m=256, tile_n=512):
    """x: (B, T, D).  PyTorch-layout weights: w1 (4D, D), w2 (2D, D), w3 (D, 2D)."""
    B, T, D = x.shape
    M = B * T
    H2 = 2 * D                               # SwiGLU hidden width
    assert w1.shape == (4 * D, D) and w2.shape == (2 * D, D) and w3.shape == (D, H2)

    tn = _pick_tile(H2, tile_n, 128)         # multiple of 128 (lane) or full H2
    nb = H2 // tn                            # gate rows of W1 start at block index nb

    x2 = x.reshape(M, D)
    tm = min(tile_m, M)
    Mp = pl.cdiv(M, tm) * tm
    if Mp != M:                              # pad rows; padded rows are dropped after
        x2 = jnp.pad(x2, ((0, Mp - M), (0, 0)))

    # Rough VMEM budget (double-buffered tiles + f32 accumulator) -> scoped limit.
    in_b = jnp.dtype(x.dtype).itemsize
    w_b = jnp.dtype(w1.dtype).itemsize
    vmem_need = (2 * tm * D * in_b            # x tile
                 + 2 * 3 * tn * D * w_b       # w1a / w1g / w2 tiles
                 + 2 * D * tn * w_b           # w3 tile
                 + 2 * tm * D * in_b          # output tile
                 + tm * D * 4)                # f32 accumulator
    vmem_limit = int(min(max(int(1.25 * vmem_need), 32 * 1024 * 1024),
                         64 * 1024 * 1024))

    cost = pl.CostEstimate(
        flops=8 * Mp * D * H2,                                # three H2-wide GEMMs + W3 GEMM
        transcendentals=Mp * H2,                              # sigmoid
        bytes_accessed=(x2.size * in_b
                        + (w1.size + w2.size + w3.size) * w_b
                        + Mp * D * in_b))

    out = pl.pallas_call(
        _ffn_kernel,
        out_shape=jax.ShapeDtypeStruct((Mp, D), x.dtype),
        grid_spec=pltpu.PrefetchScalarGridSpec(
            num_scalar_prefetch=0,
            grid=(Mp // tm, nb),
            in_specs=[
                pl.BlockSpec((tm, D), lambda i, j: (i, 0)),        # x rows (resident over j)
                pl.BlockSpec((tn, D), lambda i, j: (j, 0)),        # W1 "a" rows
                pl.BlockSpec((tn, D), lambda i, j: (nb + j, 0)),   # W1 gate rows (same array)
                pl.BlockSpec((tn, D), lambda i, j: (j, 0)),        # W2 rows
                pl.BlockSpec((D, tn), lambda i, j: (0, j)),        # W3 contracting cols
            ],
            out_specs=pl.BlockSpec((tm, D), lambda i, j: (i, 0)),
            scratch_shapes=[pltpu.VMEM((tm, D), jnp.float32)],
        ),
        compiler_params=pltpu.CompilerParams(
            dimension_semantics=("parallel", "arbitrary"),
            vmem_limit_bytes=vmem_limit),
        cost_estimate=cost,
    )(x2, w1, w1, w2, w3)

    if Mp != M:
        out = out[:M]
    return out.reshape(B, T, D)


def _reference(x, w1, w2, w3):
    """Pure-JAX reference matching the PyTorch forward (eval mode)."""
    h1 = x @ w1.T
    d2 = w2.shape[0]
    a, g = h1[..., :d2], h1[..., d2:]
    z = a * jax.nn.silu(g) * (x @ w2.T)
    return z @ w3.T


if __name__ == "__main__":
    def _run_case(B, T, D, tile_n):
        key = jax.random.PRNGKey(0)
        kx, k1, k2, k3 = jax.random.split(key, 4)
        x = jax.random.normal(kx, (B, T, D), dtype=jnp.float32)
        # Deterministic Linear-style init: U(-1/sqrt(fan_in), 1/sqrt(fan_in)).
        w1 = jax.random.uniform(k1, (4 * D, D), jnp.float32,
                                -1.0 / math.sqrt(D), 1.0 / math.sqrt(D))
        w2 = jax.random.uniform(k2, (2 * D, D), jnp.float32,
                                -1.0 / math.sqrt(D), 1.0 / math.sqrt(D))
        w3 = jax.random.uniform(k3, (D, 2 * D), jnp.float32,
                                -1.0 / math.sqrt(2 * D), 1.0 / math.sqrt(2 * D))

        y = feed_forward(x, w1, w2, w3, tile_n=tile_n)
        jax.block_until_ready(y)

        y_ref = _reference(x, w1, w2, w3)
        assert y.shape == (B, T, D)
        assert jnp.allclose(y, y_ref, atol=1e-3, rtol=1e-3), \
            f"mismatch vs reference (D={D})"

    # Small shape consistent with the module: batch=2, seq=8, model_dim=32
    # (single hidden-axis step).
    _run_case(2, 8, 32, tile_n=512)
    # Slightly larger model_dim to exercise the multi-step hidden reduction
    # (accumulator init / accumulate / finalize path).
    _run_case(2, 8, 128, tile_n=128)

    print("KERNEL_OK")
</pallas_src>

<mosaic_0001>
module attributes {stable_mosaic.version = 11 : i64} {
  func.func @_ffn_kernel(%arg0: i32, %arg1: i32, %arg2: memref<16x32xf32, #tpu.memory_space<vmem>>, %arg3: memref<64x32xf32, #tpu.memory_space<vmem>>, %arg4: memref<64x32xf32, #tpu.memory_space<vmem>>, %arg5: memref<64x32xf32, #tpu.memory_space<vmem>>, %arg6: memref<32x64xf32, #tpu.memory_space<vmem>>, %arg7: memref<16x32xf32, #tpu.memory_space<vmem>>, %arg8: memref<16x32xf32, #tpu.memory_space<vmem>>) attributes {dimension_semantics = [#tpu.dimension_semantics<parallel>, #tpu.dimension_semantics<arbitrary>], iteration_bounds = array<i64: 1, 1>, scalar_prefetch = 0 : i64, scratch_operands = 1 : i64, tpu.core_type = #tpu.core_type<tc>, window_params = [{transform_indices = @transform_0, window_bounds = array<i64: 16, 32>}, {transform_indices = @transform_1, window_bounds = array<i64: 64, 32>}, {transform_indices = @transform_2, window_bounds = array<i64: 64, 32>}, {transform_indices = @transform_3, window_bounds = array<i64: 64, 32>}, {transform_indices = @transform_4, window_bounds = array<i64: 32, 64>}, {transform_indices = @transform_5, window_bounds = array<i64: 16, 32>}]} {
    %c0_i32 = arith.constant 0 : i32
    %0 = arith.cmpi eq, %arg1, %c0_i32 : i32
    %1 = arith.extui %0 : i1 to i32
    %c0_i32_0 = arith.constant 0 : i32
    %2 = arith.cmpi ne, %1, %c0_i32_0 : i32
    scf.if %2 {
      %cst_20 = arith.constant 0.000000e+00 : f32
      %26 = vector.broadcast %cst_20 : f32 to vector<16x32xf32>
      %c0_21 = arith.constant 0 : index
      %c0_22 = arith.constant 0 : index
      %27 = vector.load %arg8[%c0_21, %c0_22] : memref<16x32xf32, #tpu.memory_space<vmem>>, vector<16x32xf32>
      tpu.vector_store %arg8[%c0_21, %c0_22], %26 {strides = array<i32>} : memref<16x32xf32, #tpu.memory_space<vmem>>, vector<16x32xf32>,
    } else {
    }
    %c0 = arith.constant 0 : index
    %c0_1 = arith.constant 0 : index
    %3 = vector.load %arg2[%c0, %c0_1] : memref<16x32xf32, #tpu.memory_space<vmem>>, vector<16x32xf32>
    %c0_2 = arith.constant 0 : index
    %c0_3 = arith.constant 0 : index
    %4 = vector.load %arg3[%c0_2, %c0_3] : memref<64x32xf32, #tpu.memory_space<vmem>>, vector<64x32xf32>
    %cst = arith.constant dense<0.000000e+00> : vector<16x64xf32>
    %5 = tpu.matmul %3, %4, %cst {dimension_numbers = #tpu.dot_dimension_numbers<[1], [1], [0], [0], [0, 0, 1, 0], [], []>} : vector<16x32xf32>, vector<64x32xf32>, vector<16x64xf32> -> vector<16x64xf32>
    %c0_4 = arith.constant 0 : index
    %c0_5 = arith.constant 0 : index
    %6 = vector.load %arg4[%c0_4, %c0_5] : memref<64x32xf32, #tpu.memory_space<vmem>>, vector<64x32xf32>
    %cst_6 = arith.constant dense<0.000000e+00> : vector<16x64xf32>
    %7 = tpu.matmul %3, %6, %cst_6 {dimension_numbers = #tpu.dot_dimension_numbers<[1], [1], [0], [0], [0, 0, 1, 0], [], []>} : vector<16x32xf32>, vector<64x32xf32>, vector<16x64xf32> -> vector<16x64xf32>
    %c0_7 = arith.constant 0 : index
    %c0_8 = arith.constant 0 : index
    %8 = vector.load %arg5[%c0_7, %c0_8] : memref<64x32xf32, #tpu.memory_space<vmem>>, vector<64x32xf32>
    %cst_9 = arith.constant dense<0.000000e+00> : vector<16x64xf32>
    %9 = tpu.matmul %3, %8, %cst_9 {dimension_numbers = #tpu.dot_dimension_numbers<[1], [1], [0], [0], [0, 0, 1, 0], [], []>} : vector<16x32xf32>, vector<64x32xf32>, vector<16x64xf32> -> vector<16x64xf32>
    %10 = arith.negf %7 : vector<16x64xf32>
    %11 = math.exp %10 : vector<16x64xf32>
    %cst_10 = arith.constant 1.000000e+00 : f32
    %12 = vector.broadcast %cst_10 : f32 to vector<16x64xf32>
    %13 = arith.addf %12, %11 : vector<16x64xf32>
    %14 = arith.divf %12, %13 : vector<16x64xf32>
    %15 = arith.mulf %7, %14 : vector<16x64xf32>
    %16 = arith.mulf %5, %15 : vector<16x64xf32>
    %17 = arith.mulf %16, %9 : vector<16x64xf32>
    %c0_11 = arith.constant 0 : index
    %c0_12 = arith.constant 0 : index
    %18 = vector.load %arg6[%c0_11, %c0_12] : memref<32x64xf32, #tpu.memory_space<vmem>>, vector<32x64xf32>
    %c0_13 = arith.constant 0 : index
    %c0_14 = arith.constant 0 : index
    %19 = vector.load %arg8[%c0_13, %c0_14] : memref<16x32xf32, #tpu.memory_space<vmem>>, vector<16x32xf32>
    %cst_15 = arith.constant dense<0.000000e+00> : vector<16x32xf32>
    %20 = tpu.matmul %17, %18, %cst_15 {dimension_numbers = #tpu.dot_dimension_numbers<[1], [1], [0], [0], [0, 0, 1, 0], [], []>} : vector<16x64xf32>, vector<32x64xf32>, vector<16x32xf32> -> vector<16x32xf32>
    %21 = arith.addf %19, %20 : vector<16x32xf32>
    %c0_16 = arith.constant 0 : index
    %c0_17 = arith.constant 0 : index
    %22 = vector.load %arg8[%c0_16, %c0_17] : memref<16x32xf32, #tpu.memory_space<vmem>>, vector<16x32xf32>
    tpu.vector_store %arg8[%c0_16, %c0_17], %21 {strides = array<i32>} : memref<16x32xf32, #tpu.memory_space<vmem>>, vector<16x32xf32>,
    %c0_i32_18 = arith.constant 0 : i32
    %23 = arith.cmpi eq, %arg1, %c0_i32_18 : i32
    %24 = arith.extui %23 : i1 to i32
    %c0_i32_19 = arith.constant 0 : i32
    %25 = arith.cmpi ne, %24, %c0_i32_19 : i32
    scf.if %25 {
      %c0_20 = arith.constant 0 : index
      %c0_21 = arith.constant 0 : index
      %26 = vector.load %arg8[%c0_20, %c0_21] : memref<16x32xf32, #tpu.memory_space<vmem>>, vector<16x32xf32>
      %c0_22 = arith.constant 0 : index
      %c0_23 = arith.constant 0 : index
      %27 = vector.load %arg7[%c0_22, %c0_23] : memref<16x32xf32, #tpu.memory_space<vmem>>, vector<16x32xf32>
      tpu.vector_store %arg7[%c0_22, %c0_23], %26 {strides = array<i32>} : memref<16x32xf32, #tpu.memory_space<vmem>>, vector<16x32xf32>,
    } else {
    }
    return
  }
  func.func @transform_0(%arg0: i32, %arg1: i32) -> (i32, i32) {
    %c0_i32 = arith.constant 0 : i32
    %c0_i32_0 = arith.constant 0 : i32
    return %arg0, %c0_i32 : i32, i32
  }
  func.func @transform_1(%arg0: i32, %arg1: i32) -> (i32, i32) {
    %c0_i32 = arith.constant 0 : i32
    %c0_i32_0 = arith.constant 0 : i32
    return %arg1, %c0_i32 : i32, i32
  }
  func.func @transform_2(%arg0: i32, %arg1: i32) -> (i32, i32) {
    %c1_i32 = arith.constant 1 : i32
    %0 = arith.addi %c1_i32, %arg1 : i32
    %c0_i32 = arith.constant 0 : i32
    %c0_i32_0 = arith.constant 0 : i32
    return %0, %c0_i32 : i32, i32
  }
  func.func @transform_3(%arg0: i32, %arg1: i32) -> (i32, i32) {
    %c0_i32 = arith.constant 0 : i32
    %c0_i32_0 = arith.constant 0 : i32
    return %arg1, %c0_i32 : i32, i32
  }
  func.func @transform_4(%arg0: i32, %arg1: i32) -> (i32, i32) {
    %c0_i32 = arith.constant 0 : i32
    %c0_i32_0 = arith.constant 0 : i32
    return %c0_i32, %arg1 : i32, i32
  }
  func.func @transform_5(%arg0: i32, %arg1: i32) -> (i32, i32) {
    %c0_i32 = arith.constant 0 : i32
    %c0_i32_0 = arith.constant 0 : i32
    return %arg0, %c0_i32 : i32, i32
  }
}

</mosaic_0001>

<bundles_post_ra>
// kernel: tpu_custom_call.1
= control target key start
LH: loop header
LB: loop body
LE: loop exit
PB: predicated region body
PF: predicated region fallthrough
CT: control target
= control target key end

     0   :  { %vm47_vm0 = vcmask 261120   ;;  %s604_s0 = inlined_call_operand.vmem [shape: f32[16,32], index: 0, kind: input, shape index: {}]   ;;  %s605_s1 = inlined_call_operand.vmem [shape: f32[128,32], index: 1, kind: input, shape index: {}]   ;;  %s606_s2 = inlined_call_operand.vmem [shape: f32[128,32], index: 2, kind: input, shape index: {}]   ;;  %s607_s3 = inlined_call_operand.vmem [shape: f32[64,32], index: 3, kind: input, shape index: {}]   ;;  %s608_s4 = inlined_call_operand.vmem [shape: f32[32,64], index: 4, kind: input, shape index: {}]   ;;  %s609_s5 = inlined_call_operand.hbm [shape: f32[16,32], index: 5, kind: output, shape index: {}]  }
   0x1   :  { %v368_v0 = vld [vmem:[%s606_s2 + $0x78] sm:$0xff]  ;;  %v367_v1 = vld [vmem:[%s606_s2 + $0x70] sm:$0xff] }
   0x2   :  { %369 = vmatpush.xpose.msk.msra.mxu1 %vm47_vm0, %v368_v0  ;;  %v176_v2 = vld [vmem:[%s607_s3 + $0x38] sm:$0xff]  ;;  %v175_v4 = vld [vmem:[%s607_s3 + $0x30] sm:$0xff] }
   0x3   :  { %379 = vmatpush.xpose.msk.msra.mxu2 %vm47_vm0, %v176_v2  ;;  %v59_v3 = vld [vmem:[%s605_s1 + $0x38] sm:$0xff]  ;;  %v58_v5 = vld [vmem:[%s605_s1 + $0x30] sm:$0xff] }
   0x4   :  { %351 = vmatpush.xpose.msk.msra.mxu0 %vm47_vm0, %v59_v3 }
   0x6   :  { %370 = vmatpush.xpose.msk.msra.mxu1 %vm47_vm0, %v367_v1 }
   0x7   :  { %10 = vsyncpa [#allocation4], 0  ;;  %v366_v6 = vld [vmem:[%s606_s2 + $0x68] sm:$0xff]  ;;  %380 = vmatpush.xpose.msk.msra.mxu2 %vm47_vm0, %v175_v4  ;;  %v365_v9 = vld [vmem:[%s606_s2 + $0x60] sm:$0xff]  ;;  %vm274_vm1 = vcmask 523264   ;;  %v435_v36 = vmov 0.0  }
   0x8   :  { %352 = vmatpush.xpose.msk.msra.mxu0 %vm47_vm0, %v58_v5  ;;  %v174_v7 = vld [vmem:[%s607_s3 + $0x28] sm:$0xff]  ;;  %v173_v10 = vld [vmem:[%s607_s3 + $0x20] sm:$0xff]  ;;  %v364_v12 = vld [vmem:[%s606_s2 + $0x58] sm:$0xff]  ;;  %48 = vst.msk [vmem:[#allocation2] sm:$0xff] %vm47_vm0, %v435_v36  ;;  %s333_s27 = sshll.u32 %s609_s5, 4  ;;  %s437_s28 = smov 128   ;;  %s334_s27 = int_to_ptr.hbm [resolvable:$true] %s333_s27 }
   0x9   :  { %v57_v8 = vld [vmem:[%s605_s1 + $0x28] sm:$0xff]  ;;  %v56_v11 = vld [vmem:[%s605_s1 + $0x20] sm:$0xff]  ;;  %v172_v13 = vld [vmem:[%s607_s3 + $0x18] sm:$0xff]  ;;  %49 = vst.msk [vmem:[#allocation2 + $0x8] sm:$0xff] %vm47_vm0, %v435_v36  ;;  %s438_s29 = smov 8  }
   0xa   :  { %371 = vmatpush.xpose.msk.msra.mxu1 %vm47_vm0, %v366_v6  ;;  %v55_v14 = vld [vmem:[%s605_s1 + $0x18] sm:$0xff]  ;;  %v363_v15 = vld [vmem:[%s606_s2 + $0x50] sm:$0xff]  ;;  %v362_v18 = vld [vmem:[%s606_s2 + $0x48] sm:$0xff] }
   0xb   :  { %381 = vmatpush.xpose.msk.msra.mxu2 %vm47_vm0, %v174_v7  ;;  %v171_v16 = vld [vmem:[%s607_s3 + $0x10] sm:$0xff]  ;;  %v170_v19 = vld [vmem:[%s607_s3 + $0x8] sm:$0xff]  ;;  %v361_v21 = vld [vmem:[%s606_s2 + $0x40] sm:$0xff] }
   0xc   :  { %353 = vmatpush.xpose.msk.msra.mxu0 %vm47_vm0, %v57_v8  ;;  %v54_v17 = vld [vmem:[%s605_s1 + $0x10] sm:$0xff]  ;;  %v53_v20 = vld [vmem:[%s605_s1 + $0x8] sm:$0xff]  ;;  %v169_v22 = vld [vmem:[%s607_s3] sm:$0xff] }
   0xd   :  { %v50_v23 = vld [vmem:[%s604_s0] sm:$0xff]  ;;  %v51_v25 = vld [vmem:[%s604_s0 + $0x8] sm:$0xff]  ;;  %v271_v26 = vld [vmem:[%s608_s4 + $0x18] sm:$0xff] }
   0xe   :  { %372 = vmatpush.xpose.msk.msra.mxu1 %vm47_vm0, %v365_v9  ;;  %v52_v24 = vld [vmem:[%s605_s1] sm:$0xff]  ;;  %391 = vmatpush.xpose.msk.msra.mxu3 %vm274_vm1, %v271_v26  ;;  %v270_v27 = vld [vmem:[%s608_s4 + $0x10] sm:$0xff]  ;;  %v269_v28 = vld [vmem:[%s608_s4 + $0x8] sm:$0xff] }
   0xf   :  { %382 = vmatpush.xpose.msk.msra.mxu2 %vm47_vm0, %v173_v10  ;;  %v268_v29 = vld [vmem:[%s608_s4] sm:$0xff]  ;;  %s436_s4 = smov [#allocation3]  }
  0x10   :  { %354 = vmatpush.xpose.msk.msra.mxu0 %vm47_vm0, %v56_v11  ;;  %v272_v5 = vld [vmem:[#allocation2] sm:$0xff]  ;;  %v273_v8 = vld [vmem:[#allocation2 + $0x8] sm:$0xff]  ;;  %s331_s24 = sshll.u32 %s436_s4, 4  ;;  %s332_s24 = int_to_ptr.vmem [resolvable:$true] %s331_s24 }
  0x12   :  { %373 = vmatpush.xpose.msk.msra.mxu1 %vm47_vm0, %v364_v12  ;;  %392 = vmatpush.xpose.msk.msra.mxu3 %vm274_vm1, %v270_v27 }
  0x13   :  { %383 = vmatpush.xpose.msk.msra.mxu2 %vm47_vm0, %v172_v13 }
  0x14   :  { %355 = vmatpush.xpose.msk.msra.mxu0 %vm47_vm0, %v55_v14 }
  0x16   :  { %374 = vmatpush.xpose.msk.msra.mxu1 %vm47_vm0, %v363_v15  ;;  %393 = vmatpush.xpose.msk.msra.mxu3 %vm274_vm1, %v269_v28 }
  0x17   :  { %384 = vmatpush.xpose.msk.msra.mxu2 %vm47_vm0, %v171_v16 }
  0x18   :  { %356 = vmatpush.xpose.msk.msra.mxu0 %vm47_vm0, %v54_v17 }
  0x1a   :  { %375 = vmatpush.xpose.msk.msra.mxu1 %vm47_vm0, %v362_v18  ;;  %394 = vmatpush.xpose.msk.msra.mxu3 %vm274_vm1, %v268_v29 }
  0x1b   :  { %385 = vmatpush.xpose.msk.msra.mxu2 %vm47_vm0, %v170_v19 }
  0x1c   :  { %357 = vmatpush.xpose.msk.msra.mxu0 %vm47_vm0, %v53_v20 }
  0x1e   :  { %376 = vmatpush.xpose.msk.msra.mxu1 %vm47_vm0, %v361_v21 }
  0x1f   :  { %386 = vmatpush.xpose.msk.msra.mxu2 %vm47_vm0, %v169_v22 }
  0x20   :  { %358 = vmatpush.xpose.msk.msra.mxu0 %vm47_vm0, %v52_v24 }
  0x21   :  { %377 = vmatmul.msk.f32.vlgmr.msra.gmra.mxu1 %vm47_vm0, %v50_v23 }
  0x22   :  { %387 = vmatmul.msk.f32.vlgmr.msra.gmra.mxu2 %vm47_vm0, %v50_v23 }
  0x23   :  { %359 = vmatmul.msk.f32.vlgmr.msra.gmra.mxu0 %vm47_vm0, %v50_v23 }
  0x29   :  { %378 = vmatmul.msk.f32.gmra.mxu1 %vm47_vm0, %v51_v25 }
  0x2a   :  { %388 = vmatmul.msk.f32.gmra.mxu2 %vm47_vm0, %v51_v25 }
  0x2b   :  { %360 = vmatmul.msk.f32.gmra.mxu0 %vm47_vm0, %v51_v25 }
  0x9e   :  { %v163_v30 = vpop.f32.mrf.mxu1 }
  0x9f   :  { %v389_v31 = vmul.f32 -1.442695, %v163_v30 }
  0xa0   :  { %v108_v48 = vpop.f32.mrf.mxu0 }
  0xa1   :  { %401 = vpow2.f32 %v389_v31 }
  0xa5   :  { %v218_v52 = vpop.f32.mrf.mxu2 }
  0xa6   :  { %v166_v32 = vpop.f32.mrf.mxu1 }
  0xa7   :  { %v402_v33 = vpop.eup %401  ;;  %v390_v34 = vmul.f32 -1.442695, %v166_v32 }
  0xa8   :  { %v230_v35 = vadd.f32 1.0, %v402_v33  ;;  %v111_v0 = vpop.f32.mrf.mxu0 }
  0xa9   :  { %403 = vpow2.f32 %v390_v34 }
  0xaa   :  { %405 = vrcp.f32 %v230_v35  ;;  %v243_v42 = vand.u32 2147483648, %v230_v35  ;;  %v241_v44 = vand.u32 2147483647, %v230_v35  ;;  %vm237_vm3 = vweird.f32 %v230_v35 }
  0xac   :  { %v244_v47 = vor.u32 1.1754944e-38, %v243_v42  ;;  %vm242_vm5 = vcmp.eq.f32.partialorder %v241_v44, 8.507059e+37 }
  0xad   :  { %v221_v2 = vpop.f32.mrf.mxu2 }
  0xaf   :  { %v404_v37 = vpop.eup %403 }
  0xb0   :  { %v406_v38 = vpop.eup %405  ;;  %v231_v39 = vadd.f32 1.0, %v404_v37 }
  0xb1   :  { %v233_v40 = vmul.f32 %v406_v38, %v230_v35  ;;  %vm238_vm2 = vweird.f32 %v406_v38 }
  0xb2   :  { %407 = vrcp.f32 %v231_v39  ;;  %vm239_vm4 = vmor %vm237_vm3, %vm238_vm2  ;;  %v258_v55 = vand.u32 2147483648, %v231_v39  ;;  %v256_v57 = vand.u32 2147483647, %v231_v39  ;;  %vm252_vm7 = vweird.f32 %v231_v39 }
  0xb3   :  { %v234_v41 = vsub.f32 1.0, %v233_v40 }
  0xb4   :  { %v259_v61 = vor.u32 1.1754944e-38, %v258_v55  ;;  %vm257_vm9 = vcmp.eq.f32.partialorder %v256_v57, 8.507059e+37 }
  0xb5   :  { %v235_v43 = vmul.f32 %v406_v38, %v234_v41 }
  0xb7   :  { %v236_v45 = vadd.f32 %v406_v38, %v235_v43 }
  0xb8   :  { %v408_v46 = vpop.eup %407 }
  0xb9   :  { %v240_v49 = vsel %vm239_vm4, %v406_v38, %v236_v45  ;;  %v248_v50 = vmul.f32 %v408_v46, %v231_v39  ;;  %vm253_vm6 = vweird.f32 %v408_v46 }
  0xba   :  { %v245_v51 = vsel %vm242_vm5, %v244_v47, %v240_v49  ;;  %vm254_vm8 = vmor %vm252_vm7, %vm253_vm6 }
  0xbb   :  { %v262_v53 = vmul.f32 %v245_v51, %v163_v30  ;;  %v249_v54 = vsub.f32 1.0, %v248_v50 }
  0xbd   :  { %v250_v56 = vmul.f32 %v408_v46, %v249_v54  ;;  %v264_v58 = vmul.f32 %v262_v53, %v108_v48 }
  0xbf   :  { %v251_v59 = vadd.f32 %v408_v46, %v250_v56  ;;  %v266_v60 = vmul.f32 %v264_v58, %v218_v52 }
  0xc1   :  { %v255_v62 = vsel %vm254_vm8, %v408_v46, %v251_v59  ;;  %395 = vmatmul.msk.f32.vlgmr.msra.gmra.mxu3 %vm274_vm1, %v266_v60 }
  0xc2   :  { %v260_v63 = vsel %vm257_vm9, %v259_v61, %v255_v62 }
  0xc3   :  { %v263_v1 = vmul.f32 %v260_v63, %v166_v32 }
  0xc5   :  { %v265_v3 = vmul.f32 %v263_v1, %v111_v0 }
  0xc7   :  { %v267_v4 = vmul.f32 %v265_v3, %v221_v2 }
  0xc9   :  { %396 = vmatmul.msk.f32.gmra.mxu3 %vm274_vm1, %v267_v4 }
 0x144   :  { %v310_v6 = vpop.f32.mrf.mxu3 }
 0x145   :  { %v316_v7 = vadd.f32 %v310_v6, %v272_v5 }
 0x147   :  { %318 = vst.msk [vmem:[#allocation2] sm:$0xff] %vm47_vm0, %v316_v7 }
 0x14c   :  { %v313_v9 = vpop.f32.mrf.mxu3 }
 0x14d   :  { %v317_v10 = vadd.f32 %v313_v9, %v273_v8 }
 0x14e   :  { %v323_v11 = vld [vmem:[#allocation2] sm:$0xff] }
 0x14f   :  { %319 = vst.msk [vmem:[#allocation2 + $0x8] sm:$0xff] %vm47_vm0, %v317_v10 }
 0x150   :  { %325 = vst.msk [vmem:[#allocation3] sm:$0xff] %vm47_vm0, %v323_v11 }
 0x156   :  { %v324_v12 = vld [vmem:[#allocation2 + $0x8] sm:$0xff] }
 0x157   :  { %326 = vst.msk [vmem:[#allocation3 + $0x8] sm:$0xff] %vm47_vm0, %v324_v12 }
 0x158   :  { %339 = dma.vmem_to_hbm [thread:$0]  %s332_s24, 256, %s334_s27, [#allocation4], %s437_s28, %s437_s28, %s438_s29  }
 0x159   :  { %433 = dma.done.wait [#allocation4], 256  }
 0x15a   :  { %434 = vsyncadd [#allocation4], 4294967040 }
 0x15b   :  { %344 = vsyncpa [#allocation4], 1 }

</bundles_post_ra>
